<compile_context>
chip_gen: v6e
topology: v6e:2x2x1
jax: 0.10.0
libtpu: 0.0.40
codegen_flags: <defaults>
</compile_context>

<pallas_src>
import jax
import jax.numpy as jnp
from jax.experimental import pallas as pl
from jax.experimental.pallas import tpu as pltpu


def _downsample_kernel(w_ref, x_ref, s_ref, o_ref):
    """One (batch, row-tile) grid step.

    w_ref: (C_out, C_in) f32 in SMEM -- 1x1 conv weight, pre-scaled by 0.25.
    x_ref: (C_in, 2*TH, W)  VMEM input row strip (NCHW, batch dim squeezed).
    s_ref: (W, Wo)          VMEM-resident column-pair 0/1 selection matrix.
    o_ref: (C_out, TH, Wo)  VMEM output block (lane dim = Wo).
    """
    c_in, two_th, w = x_ref.shape
    c_out, th, wo = o_ref.shape
    f32 = jnp.float32

    # Row-pair sum: two sublane-strided loads + one VPU add (in input dtype).
    x_even = x_ref[:, pl.ds(0, th, stride=2), :]          # (C_in, TH, W)
    x_odd = x_ref[:, pl.ds(1, th, stride=2), :]           # (C_in, TH, W)
    rowsum = x_even + x_odd                                # (C_in, TH, W)

    # Column-pair sum via the resident 0/1 matrix.  Fused over channels when the
    # sublane-dim reshape is tile-aligned (TH % 8 == 0); per-channel otherwise.
    s_mat = s_ref[...]                                     # (W, Wo)
    if th % 8 == 0:
        rowsum2d = rowsum.reshape(c_in * th, w)            # layout-preserving
        pooled = jnp.dot(rowsum2d, s_mat, preferred_element_type=f32)
        pooled = pooled.reshape(c_in, th, wo)              # (C_in, TH, Wo) f32
    else:
        pooled = jnp.einsum("ctw,wv->ctv", rowsum, s_mat,
                            preferred_element_type=f32)    # (C_in, TH, Wo) f32

    # 1x1 conv over channels: K = C_in is far too small for the MXU, so do
    # unrolled VPU multiply-adds with scalar weights read from SMEM.
    for co in range(c_out):
        acc = w_ref[co, 0] * pooled[0]
        for ci in range(1, c_in):
            acc = acc + w_ref[co, ci] * pooled[ci]
        o_ref[co] = acc.astype(o_ref.dtype)


def _pick_row_tile(n_batch, ho, w, c_in, c_out, itemsize,
                   budget_bytes=12 * 1024 * 1024):
    """Pick the output-row tile TH.

    Constraints: TH divides Ho and (TH % 8 == 0 or TH == Ho) so both the input
    (2*TH) and output (TH) blocks satisfy the (8, 128) rule.  The VMEM footprint
    estimate counts double-buffered input/output blocks, the resident column
    matrix, and in-kernel temporaries.  Prefers an even total number of grid
    steps (v7x megacore) as long as that costs at most a 2x smaller tile.
    """
    wo = w // 2

    def footprint(th):
        xb = c_in * 2 * th * w * itemsize            # input block
        ob = c_out * th * wo * itemsize              # output block
        sm = w * wo * itemsize                       # resident column matrix
        tmp = (3 * c_in * th * w * itemsize          # x_even, x_odd, rowsum
               + c_in * th * wo * 4                  # pooled (f32)
               + 2 * th * wo * 4)                    # conv accumulators (f32)
        return 2 * (xb + ob + sm) + tmp              # blocks double-buffered

    cands = [d for d in range(1, ho + 1)
             if ho % d == 0 and (d == ho or d % 8 == 0)]
    fitting = [d for d in cands if footprint(d) <= budget_bytes]
    if fitting:
        best = max(fitting)
        even = [d for d in fitting
                if (n_batch * (ho // d)) % 2 == 0 and 2 * d >= best]
        return max(even) if even else best
    # Best effort: smallest legal tile (only hit when Ho has no divisor that is
    # a multiple of 8 small enough to fit the budget).
    return min(cands)


def downsample(x_nchw, weight):
    """x_nchw: (N, C_in, H, W); weight: (C_out, C_in, 1, 1).
    Returns (N, C_out, H//2, W//2)."""
    N, C_in, H, W = x_nchw.shape
    C_out = weight.shape[0]
    if H % 2 or W % 2:
        # bilinear 0.5x == 2x2 avg pool only holds for even spatial dims.
        raise ValueError("downsample kernel requires even H and W")
    Ho, Wo = H // 2, W // 2
    itemsize = jnp.dtype(x_nchw.dtype).itemsize
    TH = _pick_row_tile(N, Ho, W, C_in, C_out, itemsize)

    # Fold the 0.25 pooling scale into the 1x1-conv weight (host side, 24 elems).
    wts = (0.25 * weight[:, :, 0, 0]).astype(jnp.float32)          # (C_out, C_in)

    # Column-pair selection matrix  S[c, j] = 1.0 iff c // 2 == j   -> (W, Wo),
    # built once on the host, DMA'd once, VMEM-resident across grid steps.
    s_mat = (jnp.arange(W)[:, None] // 2
             == jnp.arange(Wo)[None, :]).astype(x_nchw.dtype)

    out = pl.pallas_call(
        _downsample_kernel,
        grid=(N, Ho // TH),
        in_specs=[
            pl.BlockSpec(memory_space=pltpu.MemorySpace.SMEM),     # weights
            pl.BlockSpec((None, C_in, 2 * TH, W), lambda n, r: (n, 0, r, 0)),
            pl.BlockSpec((W, Wo), lambda n, r: (0, 0)),            # resident
        ],
        out_specs=pl.BlockSpec((None, C_out, TH, Wo), lambda n, r: (n, 0, r, 0)),
        out_shape=jax.ShapeDtypeStruct((N, C_out, Ho, Wo), x_nchw.dtype),
        compiler_params=pltpu.CompilerParams(
            dimension_semantics=("parallel", "parallel"),
            vmem_limit_bytes=32 * 1024 * 1024,
        ),
    )(wts, x_nchw, s_mat)
    return out


def _reference(x_nchw, weight):
    """Pure-JAX reference: 2x2 avg pool (== bilinear 0.5x, align_corners=False)
    followed by a 1x1 conv without bias."""
    x = x_nchw
    pooled = 0.25 * (
        x[:, :, 0::2, 0::2]
        + x[:, :, 0::2, 1::2]
        + x[:, :, 1::2, 0::2]
        + x[:, :, 1::2, 1::2]
    )
    w = weight[:, :, 0, 0]  # (C_out, C_in)
    return jnp.einsum("ncHW,oc->noHW", pooled, w)


if __name__ == "__main__":
    # Small shapes consistent with the module: in_channels=4, s_factor=2
    N, C_in, H, W = 2, 4, 16, 16
    s_factor = 2
    C_out = C_in + s_factor

    key = jax.random.PRNGKey(0)
    kx, kw = jax.random.split(key)
    x = jax.random.normal(kx, (N, C_in, H, W), dtype=jnp.float32)
    weight = (
        jax.random.normal(kw, (C_out, C_in, 1, 1), dtype=jnp.float32)
        * (1.0 / jnp.sqrt(C_in))
    )

    y = downsample(x, weight)
    jax.block_until_ready(y)

    y_ref = _reference(x, weight)
    assert y.shape == (N, C_out, H // 2, W // 2), y.shape
    assert jnp.allclose(y, y_ref, rtol=1e-4, atol=1e-4), "mismatch vs reference"

    print("KERNEL_OK")
</pallas_src>

<mosaic_0001>
module attributes {stable_mosaic.version = 11 : i64} {
  func.func @_downsample_kernel(%arg0: i32, %arg1: i32, %arg2: memref<6x4xf32, #tpu.memory_space<smem>>, %arg3: memref<1x4x16x16xf32, #tpu.memory_space<vmem>>, %arg4: memref<16x8xf32, #tpu.memory_space<vmem>>, %arg5: memref<1x6x8x8xf32, #tpu.memory_space<vmem>>) attributes {dimension_semantics = [#tpu.dimension_semantics<parallel>, #tpu.dimension_semantics<parallel>], iteration_bounds = array<i64: 2, 1>, scalar_prefetch = 0 : i64, scratch_operands = 0 : i64, tpu.core_type = #tpu.core_type<tc>, window_params = [{transform_indices = @transform_0, window_bounds = array<i64: 6, 4>}, {transform_indices = @transform_1, window_bounds = array<i64: 1, 4, 16, 16>}, {pipeline_mode = #tpu.pipeline_mode<synchronous>, transform_indices = @transform_2, window_bounds = array<i64: 16, 8>}, {transform_indices = @transform_3, window_bounds = array<i64: 1, 6, 8, 8>}]} {
    %c0 = arith.constant 0 : index
    %c0_0 = arith.constant 0 : index
    %c0_1 = arith.constant 0 : index
    %c0_2 = arith.constant 0 : index
    %0 = tpu.strided_load %arg3[%c0, %c0_0, %c0_1, %c0_2] {strides = array<i32: 1, 1, 2, 1>} : memref<1x4x16x16xf32, #tpu.memory_space<vmem>>, vector<1x4x8x16xf32>
    %1 = vector.shape_cast %0 : vector<1x4x8x16xf32> to vector<4x8x16xf32>
    %c0_3 = arith.constant 0 : index
    %c0_4 = arith.constant 0 : index
    %c1 = arith.constant 1 : index
    %c0_5 = arith.constant 0 : index
    %2 = tpu.strided_load %arg3[%c0_3, %c0_4, %c1, %c0_5] {strides = array<i32: 1, 1, 2, 1>} : memref<1x4x16x16xf32, #tpu.memory_space<vmem>>, vector<1x4x8x16xf32>
    %3 = vector.shape_cast %2 : vector<1x4x8x16xf32> to vector<4x8x16xf32>
    %4 = arith.addf %1, %3 : vector<4x8x16xf32>
    %c0_6 = arith.constant 0 : index
    %c0_7 = arith.constant 0 : index
    %5 = vector.load %arg4[%c0_6, %c0_7] : memref<16x8xf32, #tpu.memory_space<vmem>>, vector<16x8xf32>
    %6 = vector.shape_cast %4 : vector<4x8x16xf32> to vector<32x16xf32>
    %cst = arith.constant dense<0.000000e+00> : vector<32x8xf32>
    %7 = tpu.matmul %6, %5, %cst {dimension_numbers = #tpu.dot_dimension_numbers<[1], [0], [0], [1], [0, 0, 1, 1], [], []>} : vector<32x16xf32>, vector<16x8xf32>, vector<32x8xf32> -> vector<32x8xf32>
    %8 = vector.shape_cast %7 : vector<32x8xf32> to vector<4x8x8xf32>
    %c0_8 = arith.constant 0 : index
    %c0_9 = arith.constant 0 : index
    %9 = memref.load %arg2[%c0_8, %c0_9] : memref<6x4xf32, #tpu.memory_space<smem>>
    %10 = vector.extract_strided_slice %8 {offsets = [0, 0, 0], sizes = [1, 8, 8], strides = [1, 1, 1]} : vector<4x8x8xf32> to vector<1x8x8xf32>
    %11 = vector.shape_cast %10 : vector<1x8x8xf32> to vector<8x8xf32>
    %12 = vector.broadcast %9 : f32 to vector<8x8xf32>
    %13 = arith.mulf %12, %11 : vector<8x8xf32>
    %c0_10 = arith.constant 0 : index
    %c1_11 = arith.constant 1 : index
    %14 = memref.load %arg2[%c0_10, %c1_11] : memref<6x4xf32, #tpu.memory_space<smem>>
    %15 = vector.extract_strided_slice %8 {offsets = [1, 0, 0], sizes = [1, 8, 8], strides = [1, 1, 1]} : vector<4x8x8xf32> to vector<1x8x8xf32>
    %16 = vector.shape_cast %15 : vector<1x8x8xf32> to vector<8x8xf32>
    %17 = vector.broadcast %14 : f32 to vector<8x8xf32>
    %18 = arith.mulf %17, %16 : vector<8x8xf32>
    %19 = arith.addf %13, %18 : vector<8x8xf32>
    %c0_12 = arith.constant 0 : index
    %c2 = arith.constant 2 : index
    %20 = memref.load %arg2[%c0_12, %c2] : memref<6x4xf32, #tpu.memory_space<smem>>
    %21 = vector.extract_strided_slice %8 {offsets = [2, 0, 0], sizes = [1, 8, 8], strides = [1, 1, 1]} : vector<4x8x8xf32> to vector<1x8x8xf32>
    %22 = vector.shape_cast %21 : vector<1x8x8xf32> to vector<8x8xf32>
    %23 = vector.broadcast %20 : f32 to vector<8x8xf32>
    %24 = arith.mulf %23, %22 : vector<8x8xf32>
    %25 = arith.addf %19, %24 : vector<8x8xf32>
    %c0_13 = arith.constant 0 : index
    %c3 = arith.constant 3 : index
    %26 = memref.load %arg2[%c0_13, %c3] : memref<6x4xf32, #tpu.memory_space<smem>>
    %27 = vector.extract_strided_slice %8 {offsets = [3, 0, 0], sizes = [1, 8, 8], strides = [1, 1, 1]} : vector<4x8x8xf32> to vector<1x8x8xf32>
    %28 = vector.shape_cast %27 : vector<1x8x8xf32> to vector<8x8xf32>
    %29 = vector.broadcast %26 : f32 to vector<8x8xf32>
    %30 = arith.mulf %29, %28 : vector<8x8xf32>
    %31 = arith.addf %25, %30 : vector<8x8xf32>
    %c0_14 = arith.constant 0 : index
    %c0_15 = arith.constant 0 : index
    %c0_16 = arith.constant 0 : index
    %c0_17 = arith.constant 0 : index
    %32 = vector.load %arg5[%c0_14, %c0_15, %c0_16, %c0_17] : memref<1x6x8x8xf32, #tpu.memory_space<vmem>>, vector<1x1x8x8xf32>
    %33 = vector.shape_cast %32 : vector<1x1x8x8xf32> to vector<8x8xf32>
    %34 = vector.shape_cast %31 : vector<8x8xf32> to vector<1x1x8x8xf32>
    tpu.vector_store %arg5[%c0_14, %c0_15, %c0_16, %c0_17], %34 {strides = array<i32>} : memref<1x6x8x8xf32, #tpu.memory_space<vmem>>, vector<1x1x8x8xf32>,
    %c1_18 = arith.constant 1 : index
    %c0_19 = arith.constant 0 : index
    %35 = memref.load %arg2[%c1_18, %c0_19] : memref<6x4xf32, #tpu.memory_space<smem>>
    %36 = vector.extract_strided_slice %8 {offsets = [0, 0, 0], sizes = [1, 8, 8], strides = [1, 1, 1]} : vector<4x8x8xf32> to vector<1x8x8xf32>
    %37 = vector.shape_cast %36 : vector<1x8x8xf32> to vector<8x8xf32>
    %38 = vector.broadcast %35 : f32 to vector<8x8xf32>
    %39 = arith.mulf %38, %37 : vector<8x8xf32>
    %c1_20 = arith.constant 1 : index
    %c1_21 = arith.constant 1 : index
    %40 = memref.load %arg2[%c1_20, %c1_21] : memref<6x4xf32, #tpu.memory_space<smem>>
    %41 = vector.extract_strided_slice %8 {offsets = [1, 0, 0], sizes = [1, 8, 8], strides = [1, 1, 1]} : vector<4x8x8xf32> to vector<1x8x8xf32>
    %42 = vector.shape_cast %41 : vector<1x8x8xf32> to vector<8x8xf32>
    %43 = vector.broadcast %40 : f32 to vector<8x8xf32>
    %44 = arith.mulf %43, %42 : vector<8x8xf32>
    %45 = arith.addf %39, %44 : vector<8x8xf32>
    %c1_22 = arith.constant 1 : index
    %c2_23 = arith.constant 2 : index
    %46 = memref.load %arg2[%c1_22, %c2_23] : memref<6x4xf32, #tpu.memory_space<smem>>
    %47 = vector.extract_strided_slice %8 {offsets = [2, 0, 0], sizes = [1, 8, 8], strides = [1, 1, 1]} : vector<4x8x8xf32> to vector<1x8x8xf32>
    %48 = vector.shape_cast %47 : vector<1x8x8xf32> to vector<8x8xf32>
    %49 = vector.broadcast %46 : f32 to vector<8x8xf32>
    %50 = arith.mulf %49, %48 : vector<8x8xf32>
    %51 = arith.addf %45, %50 : vector<8x8xf32>
    %c1_24 = arith.constant 1 : index
    %c3_25 = arith.constant 3 : index
    %52 = memref.load %arg2[%c1_24, %c3_25] : memref<6x4xf32, #tpu.memory_space<smem>>
    %53 = vector.extract_strided_slice %8 {offsets = [3, 0, 0], sizes = [1, 8, 8], strides = [1, 1, 1]} : vector<4x8x8xf32> to vector<1x8x8xf32>
    %54 = vector.shape_cast %53 : vector<1x8x8xf32> to vector<8x8xf32>
    %55 = vector.broadcast %52 : f32 to vector<8x8xf32>
    %56 = arith.mulf %55, %54 : vector<8x8xf32>
    %57 = arith.addf %51, %56 : vector<8x8xf32>
    %c0_26 = arith.constant 0 : index
    %c1_27 = arith.constant 1 : index
    %c0_28 = arith.constant 0 : index
    %c0_29 = arith.constant 0 : index
    %58 = vector.load %arg5[%c0_26, %c1_27, %c0_28, %c0_29] : memref<1x6x8x8xf32, #tpu.memory_space<vmem>>, vector<1x1x8x8xf32>
    %59 = vector.shape_cast %58 : vector<1x1x8x8xf32> to vector<8x8xf32>
    %60 = vector.shape_cast %57 : vector<8x8xf32> to vector<1x1x8x8xf32>
    tpu.vector_store %arg5[%c0_26, %c1_27, %c0_28, %c0_29], %60 {strides = array<i32>} : memref<1x6x8x8xf32, #tpu.memory_space<vmem>>, vector<1x1x8x8xf32>,
    %c2_30 = arith.constant 2 : index
    %c0_31 = arith.constant 0 : index
    %61 = memref.load %arg2[%c2_30, %c0_31] : memref<6x4xf32, #tpu.memory_space<smem>>
    %62 = vector.extract_strided_slice %8 {offsets = [0, 0, 0], sizes = [1, 8, 8], strides = [1, 1, 1]} : vector<4x8x8xf32> to vector<1x8x8xf32>
    %63 = vector.shape_cast %62 : vector<1x8x8xf32> to vector<8x8xf32>
    %64 = vector.broadcast %61 : f32 to vector<8x8xf32>
    %65 = arith.mulf %64, %63 : vector<8x8xf32>
    %c2_32 = arith.constant 2 : index
    %c1_33 = arith.constant 1 : index
    %66 = memref.load %arg2[%c2_32, %c1_33] : memref<6x4xf32, #tpu.memory_space<smem>>
    %67 = vector.extract_strided_slice %8 {offsets = [1, 0, 0], sizes = [1, 8, 8], strides = [1, 1, 1]} : vector<4x8x8xf32> to vector<1x8x8xf32>
    %68 = vector.shape_cast %67 : vector<1x8x8xf32> to vector<8x8xf32>
    %69 = vector.broadcast %66 : f32 to vector<8x8xf32>
    %70 = arith.mulf %69, %68 : vector<8x8xf32>
    %71 = arith.addf %65, %70 : vector<8x8xf32>
    %c2_34 = arith.constant 2 : index
    %c2_35 = arith.constant 2 : index
    %72 = memref.load %arg2[%c2_34, %c2_35] : memref<6x4xf32, #tpu.memory_space<smem>>
    %73 = vector.extract_strided_slice %8 {offsets = [2, 0, 0], sizes = [1, 8, 8], strides = [1, 1, 1]} : vector<4x8x8xf32> to vector<1x8x8xf32>
    %74 = vector.shape_cast %73 : vector<1x8x8xf32> to vector<8x8xf32>
    %75 = vector.broadcast %72 : f32 to vector<8x8xf32>
    %76 = arith.mulf %75, %74 : vector<8x8xf32>
    %77 = arith.addf %71, %76 : vector<8x8xf32>
    %c2_36 = arith.constant 2 : index
    %c3_37 = arith.constant 3 : index
    %78 = memref.load %arg2[%c2_36, %c3_37] : memref<6x4xf32, #tpu.memory_space<smem>>
    %79 = vector.extract_strided_slice %8 {offsets = [3, 0, 0], sizes = [1, 8, 8], strides = [1, 1, 1]} : vector<4x8x8xf32> to vector<1x8x8xf32>
    %80 = vector.shape_cast %79 : vector<1x8x8xf32> to vector<8x8xf32>
    %81 = vector.broadcast %78 : f32 to vector<8x8xf32>
    %82 = arith.mulf %81, %80 : vector<8x8xf32>
    %83 = arith.addf %77, %82 : vector<8x8xf32>
    %c0_38 = arith.constant 0 : index
    %c2_39 = arith.constant 2 : index
    %c0_40 = arith.constant 0 : index
    %c0_41 = arith.constant 0 : index
    %84 = vector.load %arg5[%c0_38, %c2_39, %c0_40, %c0_41] : memref<1x6x8x8xf32, #tpu.memory_space<vmem>>, vector<1x1x8x8xf32>
    %85 = vector.shape_cast %84 : vector<1x1x8x8xf32> to vector<8x8xf32>
    %86 = vector.shape_cast %83 : vector<8x8xf32> to vector<1x1x8x8xf32>
    tpu.vector_store %arg5[%c0_38, %c2_39, %c0_40, %c0_41], %86 {strides = array<i32>} : memref<1x6x8x8xf32, #tpu.memory_space<vmem>>, vector<1x1x8x8xf32>,
    %c3_42 = arith.constant 3 : index
    %c0_43 = arith.constant 0 : index
    %87 = memref.load %arg2[%c3_42, %c0_43] : memref<6x4xf32, #tpu.memory_space<smem>>
    %88 = vector.extract_strided_slice %8 {offsets = [0, 0, 0], sizes = [1, 8, 8], strides = [1, 1, 1]} : vector<4x8x8xf32> to vector<1x8x8xf32>
    %89 = vector.shape_cast %88 : vector<1x8x8xf32> to vector<8x8xf32>
    %90 = vector.broadcast %87 : f32 to vector<8x8xf32>
    %91 = arith.mulf %90, %89 : vector<8x8xf32>
    %c3_44 = arith.constant 3 : index
    %c1_45 = arith.constant 1 : index
    %92 = memref.load %arg2[%c3_44, %c1_45] : memref<6x4xf32, #tpu.memory_space<smem>>
    %93 = vector.extract_strided_slice %8 {offsets = [1, 0, 0], sizes = [1, 8, 8], strides = [1, 1, 1]} : vector<4x8x8xf32> to vector<1x8x8xf32>
    %94 = vector.shape_cast %93 : vector<1x8x8xf32> to vector<8x8xf32>
    %95 = vector.broadcast %92 : f32 to vector<8x8xf32>
    %96 = arith.mulf %95, %94 : vector<8x8xf32>
    %97 = arith.addf %91, %96 : vector<8x8xf32>
    %c3_46 = arith.constant 3 : index
    %c2_47 = arith.constant 2 : index
    %98 = memref.load %arg2[%c3_46, %c2_47] : memref<6x4xf32, #tpu.memory_space<smem>>
    %99 = vector.extract_strided_slice %8 {offsets = [2, 0, 0], sizes = [1, 8, 8], strides = [1, 1, 1]} : vector<4x8x8xf32> to vector<1x8x8xf32>
    %100 = vector.shape_cast %99 : vector<1x8x8xf32> to vector<8x8xf32>
    %101 = vector.broadcast %98 : f32 to vector<8x8xf32>
    %102 = arith.mulf %101, %100 : vector<8x8xf32>
    %103 = arith.addf %97, %102 : vector<8x8xf32>
    %c3_48 = arith.constant 3 : index
    %c3_49 = arith.constant 3 : index
    %104 = memref.load %arg2[%c3_48, %c3_49] : memref<6x4xf32, #tpu.memory_space<smem>>
    %105 = vector.extract_strided_slice %8 {offsets = [3, 0, 0], sizes = [1, 8, 8], strides = [1, 1, 1]} : vector<4x8x8xf32> to vector<1x8x8xf32>
    %106 = vector.shape_cast %105 : vector<1x8x8xf32> to vector<8x8xf32>
    %107 = vector.broadcast %104 : f32 to vector<8x8xf32>
    %108 = arith.mulf %107, %106 : vector<8x8xf32>
    %109 = arith.addf %103, %108 : vector<8x8xf32>
    %c0_50 = arith.constant 0 : index
    %c3_51 = arith.constant 3 : index
    %c0_52 = arith.constant 0 : index
    %c0_53 = arith.constant 0 : index
    %110 = vector.load %arg5[%c0_50, %c3_51, %c0_52, %c0_53] : memref<1x6x8x8xf32, #tpu.memory_space<vmem>>, vector<1x1x8x8xf32>
    %111 = vector.shape_cast %110 : vector<1x1x8x8xf32> to vector<8x8xf32>
    %112 = vector.shape_cast %109 : vector<8x8xf32> to vector<1x1x8x8xf32>
    tpu.vector_store %arg5[%c0_50, %c3_51, %c0_52, %c0_53], %112 {strides = array<i32>} : memref<1x6x8x8xf32, #tpu.memory_space<vmem>>, vector<1x1x8x8xf32>,
    %c4 = arith.constant 4 : index
    %c0_54 = arith.constant 0 : index
    %113 = memref.load %arg2[%c4, %c0_54] : memref<6x4xf32, #tpu.memory_space<smem>>
    %114 = vector.extract_strided_slice %8 {offsets = [0, 0, 0], sizes = [1, 8, 8], strides = [1, 1, 1]} : vector<4x8x8xf32> to vector<1x8x8xf32>
    %115 = vector.shape_cast %114 : vector<1x8x8xf32> to vector<8x8xf32>
    %116 = vector.broadcast %113 : f32 to vector<8x8xf32>
    %117 = arith.mulf %116, %115 : vector<8x8xf32>
    %c4_55 = arith.constant 4 : index
    %c1_56 = arith.constant 1 : index
    %118 = memref.load %arg2[%c4_55, %c1_56] : memref<6x4xf32, #tpu.memory_space<smem>>
    %119 = vector.extract_strided_slice %8 {offsets = [1, 0, 0], sizes = [1, 8, 8], strides = [1, 1, 1]} : vector<4x8x8xf32> to vector<1x8x8xf32>
    %120 = vector.shape_cast %119 : vector<1x8x8xf32> to vector<8x8xf32>
    %121 = vector.broadcast %118 : f32 to vector<8x8xf32>
    %122 = arith.mulf %121, %120 : vector<8x8xf32>
    %123 = arith.addf %117, %122 : vector<8x8xf32>
    %c4_57 = arith.constant 4 : index
    %c2_58 = arith.constant 2 : index
    %124 = memref.load %arg2[%c4_57, %c2_58] : memref<6x4xf32, #tpu.memory_space<smem>>
    %125 = vector.extract_strided_slice %8 {offsets = [2, 0, 0], sizes = [1, 8, 8], strides = [1, 1, 1]} : vector<4x8x8xf32> to vector<1x8x8xf32>
    %126 = vector.shape_cast %125 : vector<1x8x8xf32> to vector<8x8xf32>
    %127 = vector.broadcast %124 : f32 to vector<8x8xf32>
    %128 = arith.mulf %127, %126 : vector<8x8xf32>
    %129 = arith.addf %123, %128 : vector<8x8xf32>
    %c4_59 = arith.constant 4 : index
    %c3_60 = arith.constant 3 : index
    %130 = memref.load %arg2[%c4_59, %c3_60] : memref<6x4xf32, #tpu.memory_space<smem>>
    %131 = vector.extract_strided_slice %8 {offsets = [3, 0, 0], sizes = [1, 8, 8], strides = [1, 1, 1]} : vector<4x8x8xf32> to vector<1x8x8xf32>
    %132 = vector.shape_cast %131 : vector<1x8x8xf32> to vector<8x8xf32>
    %133 = vector.broadcast %130 : f32 to vector<8x8xf32>
    %134 = arith.mulf %133, %132 : vector<8x8xf32>
    %135 = arith.addf %129, %134 : vector<8x8xf32>
    %c0_61 = arith.constant 0 : index
    %c4_62 = arith.constant 4 : index
    %c0_63 = arith.constant 0 : index
    %c0_64 = arith.constant 0 : index
    %136 = vector.load %arg5[%c0_61, %c4_62, %c0_63, %c0_64] : memref<1x6x8x8xf32, #tpu.memory_space<vmem>>, vector<1x1x8x8xf32>
    %137 = vector.shape_cast %136 : vector<1x1x8x8xf32> to vector<8x8xf32>
    %138 = vector.shape_cast %135 : vector<8x8xf32> to vector<1x1x8x8xf32>
    tpu.vector_store %arg5[%c0_61, %c4_62, %c0_63, %c0_64], %138 {strides = array<i32>} : memref<1x6x8x8xf32, #tpu.memory_space<vmem>>, vector<1x1x8x8xf32>,
    %c5 = arith.constant 5 : index
    %c0_65 = arith.constant 0 : index
    %139 = memref.load %arg2[%c5, %c0_65] : memref<6x4xf32, #tpu.memory_space<smem>>
    %140 = vector.extract_strided_slice %8 {offsets = [0, 0, 0], sizes = [1, 8, 8], strides = [1, 1, 1]} : vector<4x8x8xf32> to vector<1x8x8xf32>
    %141 = vector.shape_cast %140 : vector<1x8x8xf32> to vector<8x8xf32>
    %142 = vector.broadcast %139 : f32 to vector<8x8xf32>
    %143 = arith.mulf %142, %141 : vector<8x8xf32>
    %c5_66 = arith.constant 5 : index
    %c1_67 = arith.constant 1 : index
    %144 = memref.load %arg2[%c5_66, %c1_67] : memref<6x4xf32, #tpu.memory_space<smem>>
    %145 = vector.extract_strided_slice %8 {offsets = [1, 0, 0], sizes = [1, 8, 8], strides = [1, 1, 1]} : vector<4x8x8xf32> to vector<1x8x8xf32>
    %146 = vector.shape_cast %145 : vector<1x8x8xf32> to vector<8x8xf32>
    %147 = vector.broadcast %144 : f32 to vector<8x8xf32>
    %148 = arith.mulf %147, %146 : vector<8x8xf32>
    %149 = arith.addf %143, %148 : vector<8x8xf32>
    %c5_68 = arith.constant 5 : index
    %c2_69 = arith.constant 2 : index
    %150 = memref.load %arg2[%c5_68, %c2_69] : memref<6x4xf32, #tpu.memory_space<smem>>
    %151 = vector.extract_strided_slice %8 {offsets = [2, 0, 0], sizes = [1, 8, 8], strides = [1, 1, 1]} : vector<4x8x8xf32> to vector<1x8x8xf32>
    %152 = vector.shape_cast %151 : vector<1x8x8xf32> to vector<8x8xf32>
    %153 = vector.broadcast %150 : f32 to vector<8x8xf32>
    %154 = arith.mulf %153, %152 : vector<8x8xf32>
    %155 = arith.addf %149, %154 : vector<8x8xf32>
    %c5_70 = arith.constant 5 : index
    %c3_71 = arith.constant 3 : index
    %156 = memref.load %arg2[%c5_70, %c3_71] : memref<6x4xf32, #tpu.memory_space<smem>>
    %157 = vector.extract_strided_slice %8 {offsets = [3, 0, 0], sizes = [1, 8, 8], strides = [1, 1, 1]} : vector<4x8x8xf32> to vector<1x8x8xf32>
    %158 = vector.shape_cast %157 : vector<1x8x8xf32> to vector<8x8xf32>
    %159 = vector.broadcast %156 : f32 to vector<8x8xf32>
    %160 = arith.mulf %159, %158 : vector<8x8xf32>
    %161 = arith.addf %155, %160 : vector<8x8xf32>
    %c0_72 = arith.constant 0 : index
    %c5_73 = arith.constant 5 : index
    %c0_74 = arith.constant 0 : index
    %c0_75 = arith.constant 0 : index
    %162 = vector.load %arg5[%c0_72, %c5_73, %c0_74, %c0_75] : memref<1x6x8x8xf32, #tpu.memory_space<vmem>>, vector<1x1x8x8xf32>
    %163 = vector.shape_cast %162 : vector<1x1x8x8xf32> to vector<8x8xf32>
    %164 = vector.shape_cast %161 : vector<8x8xf32> to vector<1x1x8x8xf32>
    tpu.vector_store %arg5[%c0_72, %c5_73, %c0_74, %c0_75], %164 {strides = array<i32>} : memref<1x6x8x8xf32, #tpu.memory_space<vmem>>, vector<1x1x8x8xf32>,
    return
  }
  func.func @transform_0(%arg0: i32, %arg1: i32) -> (i32, i32) {
    %c0_i32 = arith.constant 0 : i32
    %c0_i32_0 = arith.constant 0 : i32
    %c0_i32_1 = arith.constant 0 : i32
    return %c0_i32, %c0_i32_0 : i32, i32
  }
  func.func @transform_1(%arg0: i32, %arg1: i32) -> (i32, i32, i32, i32) {
    %c0_i32 = arith.constant 0 : i32
    %c0_i32_0 = arith.constant 0 : i32
    %c0_i32_1 = arith.constant 0 : i32
    return %arg0, %c0_i32, %arg1, %c0_i32_0 : i32, i32, i32, i32
  }
  func.func @transform_2(%arg0: i32, %arg1: i32) -> (i32, i32) {
    %c0_i32 = arith.constant 0 : i32
    %c0_i32_0 = arith.constant 0 : i32
    %c0_i32_1 = arith.constant 0 : i32
    return %c0_i32, %c0_i32_0 : i32, i32
  }
  func.func @transform_3(%arg0: i32, %arg1: i32) -> (i32, i32, i32, i32) {
    %c0_i32 = arith.constant 0 : i32
    %c0_i32_0 = arith.constant 0 : i32
    %c0_i32_1 = arith.constant 0 : i32
    return %arg0, %c0_i32, %arg1, %c0_i32_0 : i32, i32, i32, i32
  }
}

</mosaic_0001>

<bundles_post_ra>
// kernel: tpu_custom_call.1
= control target key start
LH: loop header
LB: loop body
LE: loop exit
PB: predicated region body
PF: predicated region fallthrough
CT: control target
= control target key end

     0   :  { %s1139_s0 = inlined_call_operand.vmem [shape: f32[6,4], index: 0, kind: input, shape index: {}]   ;;  %s1140_s1 = inlined_call_operand.hbm [shape: f32[2,4,16,16], index: 1, kind: input, shape index: {}]   ;;  %s1141_s2 = inlined_call_operand.vmem [shape: f32[16,8], index: 2, kind: input, shape index: {}]   ;;  %s1142_s3 = inlined_call_operand.hbm [shape: f32[2,6,8,8], index: 3, kind: output, shape index: {}]  }
   0x1   :  { %1148 = sst [smem:[#allocation16_spill]] %s1139_s0 }
   0x2   :  { %1149 = sst [smem:[#allocation17_spill]] %s1140_s1 }
   0x3   :  { %1150 = sst [smem:[#allocation18_spill]] %s1141_s2 }
   0x4   :  { %8 = vsyncpa [#allocation5], 0 }
   0x5   :  { %9 = vsyncpa [#allocation3], 0 }
   0x6   :  { %11 = vsyncpa [#allocation3 + $0x1], 0 }
   0x7   :  { %12 = vsyncpa [#allocation4], 0 }
   0x8   :  { %14 = vsyncpa [#allocation4 + $0x1], 0  ;;  %s865_s12 = smov 0   ;;  %s867_s13 = smov 0  }
   0x9   :  { %s869_s14 = smov 0   ;;  %s871_s15 = smov 0  }
   0xa   :  { %s873_s16 = smov 0   ;;  %s875_s17 = smov 0  }
   0xb LB: > { %1151 = sst [smem:[#allocation11_spill]] %s820_s13  ;;  %s556_s18 = sadd.s32 4294967295, %s836_s17   ;;  %s836_s17 = sphi %s875_s17, %s20_s17   ;;  %s832_s16 = sphi %s873_s16, %s1175_s16   ;;  %s828_s15 = sphi %s871_s15, %s1174_s15   ;;  %s824_s14 = sphi %s869_s14, %s1173_s14   ;;  %s820_s13 = sphi %s867_s13, %s1172_s13   ;;  %s816_s12 = sphi %s865_s12, %s1171_s12  }
   0xc   : > { %1152 = sst [smem:[#allocation12_spill]] %s824_s14  ;;  %s557_s19 = sadd.s32 4294967294, %s836_s17  }
   0xd   : > { %1153 = sst [smem:[#allocation13_spill]] %s832_s16  ;;  %s62_s20 = sadd.s32 1, %s824_s14 }
   0xe   : > { %p69_p0 = scmp.ne.s32.totalorder %s824_s14, %s820_s13  ;;  %p70_p1 = scmp.eq.s32.totalorder %s836_s17, 0 }
   0xf   : > { %p75_p2 = scmp.ne.s32.totalorder %s820_s13, %s816_s12  ;;  %p903_p3 = scmp.eq.s32.totalorder %s556_s18, 0 }
  0x10   : > { %p122_p4 = scmp.eq.s32.totalorder %s556_s18, 1  ;;  %p907_p5 = por %p70_p1, %p69_p0 }
  0x11   : > { %p128_p6 = scmp.eq.s32.totalorder %s557_s19, 1  ;;  %p913_p7 = por %p903_p3, %p75_p2 }
  0x12   : > { %p917_p8 = por %p122_p4, %p69_p0  ;;  %p558_p10 = scmp.ge.s32.totalorder %s836_s17, 1 }
  0x13   : > { %p921_p9 = por %p128_p6, %p75_p2  ;;  %p135_p11 = scmp.lt.s32.totalorder %s836_s17, 3 }
  0x14   : > { %s1157_s24 = scalar_select %p917_p8, 1, 0 }
  0x15   : > { %s1158_s25 = scalar_select %p921_p9, 1, 0 }
  0x16   : > { %s1159_s0 = sld [smem:[#allocation16_spill]]  ;;  %p930_p12 = pnand %p558_p10, %p135_p11 }
  0x17   : > { %p653_p0 = scmp.lt.s32.totalorder %s836_s17, 2  ;;  %s32_s5 = sadd.s32 1, %s832_s16 }
  0x18   : > { %p640_p1 = pneg %p930_p12  ;;  %p951_p6 = scmp.ge.s32.totalorder %s32_s5, 2 }
  0x19   : > { %p940_p2 = pnand %p653_p0, %p907_p5  ;;  %s162_s7 = sand.u32 1, %s824_s14  }
  0x1a   : > { %p946_p4 = pnand %p640_p1, %p903_p3 }
  0x1c   : > { %s148_s28 = sshll.u32 %s1159_s0, 4  ;;  %p711_p11 = pneg %p946_p4  ;;  %s149_s28 = int_to_ptr.vmem [resolvable:$true] %s148_s28 }
  0x1d   : > { %s709_s8 = scalar_lea.vmem %s149_s28, 128  ;;  %p717_p13 = scmp.lt.s32.totalorder %s149_s28, %s149_s28 }
  0x1e   : > { %p710_p10 = scmp.ne.s32.totalorder %s149_s28, %s709_s8  ;;  %p718_p9 = scmp.lt.s32.totalorder %s709_s8, %s709_s8 }
  0x20   : > { %p712_p5 = pnand %p711_p11, %p710_p10  ;;  %p719_p8 = por %p718_p9, %p717_p13 }
  0x22   : > { %p713_p0 = pneg %p712_p5 }
  0x24   : > { %p720_p1 = pnand %p719_p8, %p713_p0 }
  0x26   : > { %723 = shalt.err (!%p720_p1)
}
  0x27   : > { %s838_s9 = smov [#allocation2]   ;;  %s1177_s5 = smov (%p951_p6, %s32_s5), 0 }
  0x28   : > { %643 = dma.vmem_to_smem (!%p946_p4), %s149_s28, 128, %s838_s9, [#allocation5]  }
  0x29   : > { %1164 = sst [smem:[#allocation14_spill]] %s1177_s5  ;;  %s561_s10 = sshll.u32 %s162_s7, 6 }
  0x2a   : > { %s57_s11 = ssub.s32 %s832_s16, %s1177_s5  ;;  %s609_s18 = sshll.u32 %s832_s16, 10 }
  0x2b   : > { %p60_p10 = scmp.eq.s32.totalorder %s57_s11, 0  ;;  %s1165_s1 = sld [smem:[#allocation17_spill]] }
  0x2c   : > { %s166_s27 = scalar_lea.vmem [#allocation6], %s561_s10  ;;  %s163_s0 = scalar_lea.sflag [#allocation3], %s162_s7 }
  0x2d   : > { %s175_s4 = sshll.u32 %s166_s27, 4  ;;  %p726_p8 = pneg %p940_p2  ;;  %s176_s4 = int_to_ptr.vmem [resolvable:$true] %s175_s4 }
  0x2e   : > { %s973_s8 = scalar_select %p60_p10, %s824_s14, %s62_s20  }
  0x2f   : > { %s737_s28 = scalar_lea.vmem %s176_s4, 1024  ;;  %s839_s6 = smov [#allocation6]  }
  0x30   : > { %1166 = sst [smem:[#allocation15_spill]] %s973_s8  ;;  %p738_p9 = scmp.ne.s32.totalorder %s176_s4, %s737_s28 }
  0x31   : > { %s174_s26 = scalar_lea.hbm %s1165_s1, %s609_s18  ;;  %s742_s9 = sshll.u32 %s839_s6, 4  ;;  %s743_s9 = int_to_ptr.vmem [resolvable:$false] %s742_s9 }
  0x32   : > { %p740_p13 = pnand %p738_p9, %p726_p8  ;;  %s744_s11 = scalar_lea.vmem %s743_s9, 2048 }
  0x33   : > { %p745_p6 = scmp.lt.s32.totalorder %s176_s4, %s743_s9  ;;  %p746_p11 = scmp.lt.s32.totalorder %s744_s11, %s737_s28 }
  0x34   : > { %p741_p4 = pneg %p740_p13 }
  0x35   : > { %p747_p5 = por %p746_p11, %p745_p6 }
  0x37   : > { %p748_p0 = pnand %p747_p5, %p741_p4 }
  0x39   : > { %751 = shalt.err (!%p748_p0)
}
  0x3a   : > { %s840_s10 = smov 128   ;;  %s841_s20 = smov 8  }
  0x3b   : > { %647 = dma.hbm_to_vmem [thread:$0]  (!%p940_p2), %s174_s26, 1024, %s176_s4, %s163_s0, %s840_s10, %s840_s10, %s841_s20  }
  0x3c   : > { %187 = sbr.rel (%p930_p12) target bundleno = 303 (0x12f), region = 32 }
  0x41   : > { %803 = dma.done.wait (%p903_p3), [#allocation5], 128  }
  0x42   : > { %805 = vsyncadd (%p903_p3), [#allocation5], 4294967168  ;;  %s986_s7 = sand.u32 1, %s820_s13  }
  0x43   : > { %s566_s18 = sshll.u32 %s986_s7, 6  ;;  %s194_s19 = scalar_lea.sflag [#allocation3], %s986_s7 }
  0x44   : > { %s197_s22 = scalar_lea.vmem [#allocation6], %s566_s18 }
  0x45   : > { %807 = dma.done.wait (%p913_p7), %s194_s19, 1024  }
  0x46   : > { %809 = vsyncadd (%p913_p7), %s194_s19, 4294966272 }
  0x47   : > { %202 = sfence }
  0x48   : > { %s1167_s2 = sld [smem:[#allocation18_spill]]  ;;  %v222_v2 = vld [vmem:[%s197_s22] ss:$2 sm:$0xff]  ;;  %vm243_vm0 = vcmask 130048   ;;  %v570_v3 = vld [vmem:[%s197_s22 + $0x1] ss:$2 sm:$0xff] }
  0x49   : > { %v568_v4 = vld [vmem:[%s197_s22 + $0x20] ss:$2 sm:$0xff]  ;;  %v572_v5 = vld [vmem:[%s197_s22 + $0x21] ss:$2 sm:$0xff]  ;;  %v237_v6 = vadd.f32 %v570_v3, %v222_v2  ;;  %v567_v8 = vld [vmem:[%s197_s22 + $0x10] ss:$2 sm:$0xff] }
  0x4a   : > { %v239_v7 = vadd.f32 %v572_v5, %v568_v4  ;;  %v571_v9 = vld [vmem:[%s197_s22 + $0x11] ss:$2 sm:$0xff]  ;;  %v569_v10 = vld [vmem:[%s197_s22 + $0x30] ss:$2 sm:$0xff]  ;;  %s1004_s23 = sld [smem:[#allocation2 + $0x1]]  ;;  %vm356_vm1 = vcmask 64512  }
  0x4b   : > { %v238_v11 = vadd.f32 %v571_v9, %v567_v8  ;;  %v573_v12 = vld [vmem:[%s197_s22 + $0x31] ss:$2 sm:$0xff]  ;;  %620 = vmatprep.mubr.msk.f32.mxu0 %vm243_vm0, %v237_v6  ;;  %s1006_s26 = sld [smem:[#allocation2 + $0x81]]  ;;  %p1168_p7 = scmp.ne.s32.totalorder %s1157_s24, 0 }
  0x4c   : > { %v240_v13 = vadd.f32 %v573_v12, %v569_v10  ;;  %623 = vmatprep.mubr.msk.f32.mxu1 %vm243_vm0, %v239_v7  ;;  %s1008_s27 = sld [smem:[#allocation2 + $0x101]] }
  0x4d   : > { %s1010_s4 = sld [smem:[#allocation2 + $0x181]] }
  0x4e   : > { %v242_v0 = vld [vmem:[%s1167_s2 + $0x8] sm:$0xff]  ;;  %v241_v1 = vld [vmem:[%s1167_s2] sm:$0xff]  ;;  %s1012_s28 = sld [smem:[#allocation2 + $0x201]] }
  0x4f   : > { %616 = vmatprep.subr.mxu0 %v242_v0  ;;  %626 = vmatprep.subr.mxu1 %v242_v0  ;;  %s1014_s6 = sld [smem:[#allocation2 + $0x281]] }
  0x50   : > { %617 = vmatpush3.msra.mxu0 %v242_v0  ;;  %628 = vmatpush3.msra.mxu1 %v242_v0  ;;  %s1016_s9 = sld [smem:[#allocation2 + $0x3]]  ;;  %v345_v14 = vstv %s1004_s23  ;;  %s630_s23 = smul.u32 48, %s986_s7 }
  0x51   : > { %618 = vmatprep.subr.mxu0 %v241_v1  ;;  %627 = vmatprep.subr.mxu1 %v241_v1  ;;  %s1018_s11 = sld [smem:[#allocation2 + $0x83]]  ;;  %v362_v15 = vstv %s1006_s26  ;;  %s842_s26 = smov [#allocation7]  }
  0x52   : > { %619 = vmatpush3.msra.mxu0 %v241_v1  ;;  %629 = vmatpush3.msra.mxu1 %v241_v1  ;;  %s1020_s10 = sld [smem:[#allocation2 + $0x103]]  ;;  %v379_v16 = vstv %s1008_s27  ;;  %s756_s27 = sshll.u32 %s842_s26, 4  ;;  %s757_s27 = int_to_ptr.vmem [resolvable:$false] %s756_s27 }
  0x53   : > { %621 = vmatmul.mubr.msk.f32.vlgmr.msra.gmra.mxu0 %vm243_vm0, %v238_v11  ;;  %624 = vmatmul.mubr.msk.f32.vlgmr.msra.gmra.mxu1 %vm243_vm0, %v240_v13  ;;  %s1022_s20 = sld [smem:[#allocation2 + $0x183]]  ;;  %v396_v17 = vstv %s1010_s4  ;;  %s758_s4 = scalar_lea.vmem %s757_s27, 1536 }
  0x54   : > { %s1024_s18 = sld [smem:[#allocation2 + $0x203]]  ;;  %v413_v18 = vstv %s1012_s28 }
  0x55   : > { %s1026_s19 = sld [smem:[#allocation2 + $0x283]]  ;;  %v430_v19 = vstv %s1014_s6 }
  0x56   : > { %s1028_s22 = sld [smem:[#allocation2]]  ;;  %v353_v20 = vstv %s1016_s9 }
  0x57   : > { %s1030_s0 = sld [smem:[#allocation2 + $0x80]]  ;;  %v370_v21 = vstv %s1018_s11 }
  0x58   : > { %s1032_s29 = sld [smem:[#allocation2 + $0x100]]  ;;  %v387_v22 = vstv %s1020_s10 }
  0x59   : > { %s1034_s21 = sld [smem:[#allocation2 + $0x180]]  ;;  %v404_v23 = vstv %s1022_s20 }
  0x5a   : > { %s1036_s30 = sld [smem:[#allocation2 + $0x200]]  ;;  %v421_v24 = vstv %s1024_s18 }
  0x5b   : > { %s1038_s1 = sld [smem:[#allocation2 + $0x280]]  ;;  %v438_v25 = vstv %s1026_s19 }
  0x5c   : > { %s1040_s2 = sld [smem:[#allocation2 + $0x2]]  ;;  %v342_v26 = vstv %s1028_s22 }
  0x5d   : > { %s1042_s5 = sld [smem:[#allocation2 + $0x82]]  ;;  %v359_v27 = vstv %s1030_s0 }
  0x5e   : > { %s1044_s16 = sld [smem:[#allocation2 + $0x102]]  ;;  %v376_v28 = vstv %s1032_s29 }
  0x5f   : > { %s1046_s8 = sld [smem:[#allocation2 + $0x182]]  ;;  %v393_v29 = vstv %s1034_s21 }
  0x60   : > { %s1048_s14 = sld [smem:[#allocation2 + $0x202]]  ;;  %v410_v30 = vstv %s1036_s30 }
  0x61   : > { %s1050_s13 = sld [smem:[#allocation2 + $0x282]]  ;;  %v427_v31 = vstv %s1038_s1  ;;  %s631_s1 = smul.u32 768, %s828_s15 }
  0x62   : > { %v349_v34 = vstv %s1040_s2  ;;  %s220_s2 = scalar_lea.vmem [#allocation7], %s630_s23 }
  0x63   : > { %v366_v35 = vstv %s1042_s5  ;;  %s444_s5 = scalar_lea.sflag [#allocation4], %s986_s7 }
  0x64   : > { %v383_v36 = vstv %s1044_s16  ;;  %s1083_s16 = scalar_lea.hbm %s1142_s3, %s631_s1 }
  0x65   : > { %v400_v37 = vstv %s1046_s8 }
  0x66   : > { %v417_v40 = vstv %s1048_s14 }
  0x67   : > { %v434_v41 = vstv %s1050_s13  ;;  %s458_s13 = sshll.u32 %s220_s2, 4  ;;  %s1085_s13 = int_to_ptr.vmem [resolvable:$true] %s458_s13 }
  0x68   : > { %s752_s8 = scalar_lea.vmem %s1085_s13, 768  ;;  %p759_p1 = scmp.lt.s32.totalorder %s1085_s13, %s757_s27 }
  0x69   : > { %p753_p3 = scmp.ne.s32.totalorder %s1085_s13, %s752_s8  ;;  %p760_p10 = scmp.lt.s32.totalorder %s758_s4, %s752_s8 }
  0x6b   : > { %p754_p12 = pnand %p753_p3, %p1168_p7  ;;  %p761_p8 = por %p760_p10, %p759_p1 }
  0x6d   : > { %p755_p2 = pneg %p754_p12 }
  0x6f   : > { %p762_p9 = pnand %p761_p8, %p755_p2 }
 0x113   : > { %v622_v32 = vpop.f32.mrf.mxu0  ;;  %v625_v33 = vpop.f32.mrf.mxu1 }
 0x114   : > { %v346_v38 = vmul.f32 %v622_v32, %v345_v14  ;;  %v363_v39 = vmul.f32 %v622_v32, %v362_v15  ;;  %v380_v42 = vmul.f32 %v622_v32, %v379_v16  ;;  %v397_v43 = vmul.f32 %v622_v32, %v396_v17 }
 0x115   : > { %v414_v44 = vmul.f32 %v622_v32, %v413_v18  ;;  %v431_v45 = vmul.f32 %v622_v32, %v430_v19  ;;  %v322_v46 = vpop.f32.mrf.mxu0  ;;  %v332_v47 = vpop.f32.mrf.mxu1  ;;  %v354_v48 = vmul.f32 %v625_v33, %v353_v20  ;;  %v371_v49 = vmul.f32 %v625_v33, %v370_v21 }
 0x116   : > { %v388_v50 = vmul.f32 %v625_v33, %v387_v22  ;;  %v405_v51 = vmul.f32 %v625_v33, %v404_v23  ;;  %v343_v52 = vmul.f32 %v342_v26, %v322_v46  ;;  %v360_v53 = vmul.f32 %v359_v27, %v322_v46 }
 0x117   : > { %v377_v54 = vmul.f32 %v376_v28, %v322_v46  ;;  %v394_v55 = vmul.f32 %v393_v29, %v322_v46  ;;  %v411_v56 = vmul.f32 %v410_v30, %v322_v46  ;;  %v428_v57 = vmul.f32 %v427_v31, %v322_v46 }
 0x118   : > { %v350_v58 = vmul.f32 %v349_v34, %v332_v47  ;;  %v367_v59 = vmul.f32 %v366_v35, %v332_v47  ;;  %v347_v60 = vadd.f32 %v346_v38, %v343_v52  ;;  %v364_v61 = vadd.f32 %v363_v39, %v360_v53 }
 0x119   : > { %v381_v62 = vadd.f32 %v380_v42, %v377_v54  ;;  %v398_v63 = vadd.f32 %v397_v43, %v394_v55  ;;  %v415_v0 = vadd.f32 %v414_v44, %v411_v56  ;;  %v432_v1 = vadd.f32 %v431_v45, %v428_v57 }
 0x11a   : > { %v384_v2 = vmul.f32 %v383_v36, %v332_v47  ;;  %v401_v3 = vmul.f32 %v400_v37, %v332_v47  ;;  %v351_v4 = vadd.f32 %v350_v58, %v347_v60  ;;  %v368_v5 = vadd.f32 %v367_v59, %v364_v61 }
 0x11b   : > { %v418_v6 = vmul.f32 %v417_v40, %v332_v47  ;;  %v435_v7 = vmul.f32 %v434_v41, %v332_v47  ;;  %v422_v8 = vmul.f32 %v625_v33, %v421_v24  ;;  %v439_v9 = vmul.f32 %v625_v33, %v438_v25 }
 0x11c   : > { %v385_v10 = vadd.f32 %v384_v2, %v381_v62  ;;  %v402_v11 = vadd.f32 %v401_v3, %v398_v63  ;;  %v355_v12 = vadd.f32 %v354_v48, %v351_v4  ;;  %v372_v13 = vadd.f32 %v371_v49, %v368_v5 }
 0x11d   : > { %v419_v14 = vadd.f32 %v418_v6, %v415_v0  ;;  %v436_v15 = vadd.f32 %v435_v7, %v432_v1 }
 0x11e   : > { %v389_v16 = vadd.f32 %v388_v50, %v385_v10  ;;  %v406_v17 = vadd.f32 %v405_v51, %v402_v11  ;;  %357 = vst.msk [vmem:[%s220_s2] sm:$0xff] %vm356_vm1, %v355_v12  ;;  %585 = vst.msk [vmem:[%s220_s2 + $0x8] sm:$0xff] %vm356_vm1, %v372_v13 }
 0x11f   : > { %v423_v18 = vadd.f32 %v422_v8, %v419_v14  ;;  %v440_v19 = vadd.f32 %v439_v9, %v436_v15 }
 0x120   : > { %590 = vst.msk [vmem:[%s220_s2 + $0x10] sm:$0xff] %vm356_vm1, %v389_v16  ;;  %595 = vst.msk [vmem:[%s220_s2 + $0x18] sm:$0xff] %vm356_vm1, %v406_v17 }
 0x121   : > { %600 = vst.msk [vmem:[%s220_s2 + $0x20] sm:$0xff] %vm356_vm1, %v423_v18  ;;  %605 = vst.msk [vmem:[%s220_s2 + $0x28] sm:$0xff] %vm356_vm1, %v440_v19 }
 0x122   : > { %765 = shalt.err (!%p762_p9)
}
 0x123   : > { %s766_s28 = scalar_lea.hbm %s1083_s16, 768  ;;  %s770_s11 = scalar_lea.hbm %s1142_s3, 1536 }
 0x124   : > { %p767_p13 = scmp.ne.s32.totalorder %s1083_s16, %s766_s28  ;;  %p771_p11 = scmp.lt.s32.totalorder %s1083_s16, %s1142_s3 }
 0x125   : > { %p772_p5 = scmp.lt.s32.totalorder %s770_s11, %s766_s28 }
 0x126   : > { %p768_p4 = pnand %p767_p13, %p1168_p7 }
 0x127   : > { %p773_p0 = por %p772_p5, %p771_p11 }
 0x128   : > { %p769_p6 = pneg %p768_p4 }
 0x12a   : > { %p774_p3 = pnand %p773_p0, %p769_p6 }
 0x12c   : > { %777 = shalt.err (!%p774_p3)
}
 0x12d   : > { %s843_s18 = smov 128   ;;  %s844_s19 = smov 8  }
 0x12e   : > { %638 = dma.vmem_to_hbm [thread:$0]  (%p1168_p7), %s1085_s13, 768, %s1083_s16, %s444_s5, %s843_s18, %s843_s18, %s844_s19  }
 0x12f PF: > { %s473_s22 = sand.u32 1, %s816_s12   ;;  %p1169_p12 = scmp.ne.s32.totalorder %s1158_s25, 0 }
 0x130   : > { %p1170_p2 = scmp.ge.s32.totalorder %s836_s17, 2  ;;  %s474_s0 = scalar_lea.sflag [#allocation4], %s473_s22 }
 0x132   : > { %p649_p1 = pnand %p1170_p2, %p1169_p12 }
 0x134   : > { %p650_p10 = pneg %p649_p1 }
 0x136   : > { %811 = dma.done.wait (%p650_p10), %s474_s0, 768  }
 0x137   : > { %813 = vsyncadd (%p650_p10), %s474_s0, 4294966528  ;;  %s20_s17 = sadd.s32 1, %s836_s17   ;;  %s1171_s12 = sld [smem:[#allocation11_spill]] }
 0x138   : > { %p17_p8 = scmp.ge.s32.totalorder %s20_s17, 4   ;;  %s1172_s13 = sld [smem:[#allocation12_spill]] }
 0x139   : > { %s1173_s14 = sld [smem:[#allocation15_spill]] }
 0x13a   : > { %s1174_s15 = sld [smem:[#allocation13_spill]]  ;;  %19 = sbr.rel (!%p17_p8) target bundleno = 11 (0xb), region = 94 }
 0x13b   : > { %s1175_s16 = sld [smem:[#allocation14_spill]] }
 0x13f   :  { %479 = vsyncpa [#allocation3], 1 }
 0x140   :  { %481 = vsyncpa [#allocation3 + $0x1], 1 }
 0x141   :  { %482 = vsyncpa [#allocation4], 1 }
 0x142   :  { %484 = vsyncpa [#allocation4 + $0x1], 1 }
 0x143   :  { %485 = vsyncpa [#allocation5], 1 }
 0x144   :  { %487 = vsyncpa [#allocation5 + $0x1], 1 }

</bundles_post_ra>
